<compile_context>
chip_gen: v6e
topology: v6e:2x2x1
jax: 0.10.0
libtpu: 0.0.40
codegen_flags: <defaults>
</compile_context>

<pallas_src>
import functools

import jax
import jax.numpy as jnp
from jax.experimental import pallas as pl
from jax.experimental.pallas import tpu as pltpu


def _round_up(x, m):
    return ((x + m - 1) // m) * m


# ----------------------------- Pallas kernel ------------------------------ #
def gcn2_kernel(a_ref, x_ref, w1_ref, b1_ref, w2_ref, b2_ref, o_ref):
    a = a_ref[...]                         # [Np, Np] bf16 normalized adjacency
    x = x_ref[...]                         # [Np, Fp] bf16 node features

    # layer 1: relu((A_hat @ X) @ W1 + b1)
    ax = jnp.dot(a, x, preferred_element_type=jnp.float32)              # [Np, Fp]
    h = jnp.dot(ax.astype(jnp.bfloat16), w1_ref[...],
                preferred_element_type=jnp.float32) + b1_ref[...]       # [Np, Hp]
    h = jnp.maximum(h, 0.0).astype(jnp.bfloat16)

    # layer 2: A_hat @ (H @ W2) + b2
    hw2 = jnp.dot(h, w2_ref[...], preferred_element_type=jnp.float32)   # [Np, Fp]
    out = jnp.dot(a, hw2.astype(jnp.bfloat16),
                  preferred_element_type=jnp.float32) + b2_ref[...]     # [Np, Fp]

    o_ref[...] = out.astype(o_ref.dtype)


# ------------------------------- wrapper ----------------------------------- #
@functools.partial(jax.jit)
def denoising_model_forward(a_hat, x, w1, b1, w2, b2):
    """Batched fused 2-layer GCN forward.

    a_hat: [B, N, N] f32 normalized adjacency (per graph)
    x:     [B, N, F_in] f32 node features
    w1: [F_in, H], b1: [1, H], w2: [H, F_in], b2: [1, F_in] (shared params)
    returns [B, N, F_in] f32
    """
    B, N, F_in = x.shape
    H = w1.shape[1]

    NP = _round_up(N, 8)          # sublane alignment
    FP = _round_up(F_in, 128)     # lane-dense feature dims
    HP = _round_up(H, 128)

    def pad_to(arr, shape):
        return jnp.pad(arr, [(0, t - s) for s, t in zip(arr.shape, shape)])

    # zero-padding is exact here: padded node rows only produce bias values
    # that real rows never see (A_hat has zero columns there) and are sliced
    # off; padded feature/hidden columns stay identically zero through ReLU.
    a_p = pad_to(a_hat, (B, NP, NP)).astype(jnp.bfloat16)
    x_p = pad_to(x, (B, NP, FP)).astype(jnp.bfloat16)
    w1_p = pad_to(w1, (FP, HP)).astype(jnp.bfloat16)
    b1_p = pad_to(b1, (1, HP)).astype(jnp.float32)
    w2_p = pad_to(w2, (HP, FP)).astype(jnp.bfloat16)
    b2_p = pad_to(b2, (1, FP)).astype(jnp.float32)

    flops = 2 * B * (NP * NP * FP + NP * FP * HP      # layer 1
                     + NP * HP * FP + NP * NP * FP)   # layer 2
    bytes_accessed = (a_p.size * 2 + x_p.size * 2 + w1_p.size * 2
                      + w2_p.size * 2 + b1_p.size * 4 + b2_p.size * 4
                      + B * NP * FP * 4)

    grid_spec = pltpu.PrefetchScalarGridSpec(
        num_scalar_prefetch=0,
        grid=(B,),
        in_specs=[
            pl.BlockSpec((None, NP, NP), lambda b: (b, 0, 0)),   # A_hat[b]
            pl.BlockSpec((None, NP, FP), lambda b: (b, 0, 0)),   # X[b]
            pl.BlockSpec((FP, HP), lambda b: (0, 0)),            # W1 (shared)
            pl.BlockSpec((1, HP), lambda b: (0, 0)),             # b1
            pl.BlockSpec((HP, FP), lambda b: (0, 0)),            # W2
            pl.BlockSpec((1, FP), lambda b: (0, 0)),             # b2
        ],
        out_specs=pl.BlockSpec((None, NP, FP), lambda b: (b, 0, 0)),
    )

    out_p = pl.pallas_call(
        gcn2_kernel,
        out_shape=jax.ShapeDtypeStruct((B, NP, FP), jnp.float32),
        grid_spec=grid_spec,
        compiler_params=pltpu.CompilerParams(
            dimension_semantics=("parallel",)),
        cost_estimate=pl.CostEstimate(
            flops=flops, transcendentals=0, bytes_accessed=bytes_accessed),
    )(a_p, x_p, w1_p, b1_p, w2_p, b2_p)

    return out_p[:, :N, :F_in]


# ------------------------------- JAX glue ---------------------------------- #
def gcn_normalized_adjacency(edge_index, num_nodes):
    """Dense A_hat = D^-1/2 (A + I) D^-1/2 following PyG gcn_norm
    (add_self_loops=True, edge_weight=1). Row = target, col = source."""
    src, dst = edge_index[0], edge_index[1]
    loop = jnp.arange(num_nodes, dtype=edge_index.dtype)
    src = jnp.concatenate([src, loop])
    dst = jnp.concatenate([dst, loop])
    adj = jnp.zeros((num_nodes, num_nodes), jnp.float32).at[dst, src].add(1.0)
    deg = adj.sum(axis=1)                                   # in-degree incl. self loop
    dinv = jnp.where(deg > 0, jax.lax.rsqrt(deg), 0.0)
    return dinv[:, None] * adj * dinv[None, :]


def init_params(key, input_dim, hidden_dim):
    """Deterministic synthetic parameters (GCNConv glorot weights, zero bias)."""
    k1, k2 = jax.random.split(key)

    def glorot(k, fan_in, fan_out):
        lim = jnp.sqrt(6.0 / (fan_in + fan_out))
        return jax.random.uniform(k, (fan_in, fan_out), jnp.float32, -lim, lim)

    w1 = glorot(k1, input_dim, hidden_dim)
    b1 = jnp.zeros((1, hidden_dim), jnp.float32)
    w2 = glorot(k2, hidden_dim, input_dim)
    b2 = jnp.zeros((1, input_dim), jnp.float32)
    return w1, b1, w2, b2


# --------------------------------- main ------------------------------------ #
if __name__ == "__main__":
    key = jax.random.PRNGKey(0)
    kx, kp, ke = jax.random.split(key, 3)

    batch = 4            # independent graphs processed in one pallas_call
    num_nodes = 16
    input_dim = 8
    hidden_dim = 32
    num_edges = 48

    # node features [B, N, F_in]
    x = jax.random.normal(kx, (batch, num_nodes, input_dim), jnp.float32)

    # deterministic random edge_index per graph [B, 2, E]
    edge_index = jax.random.randint(
        ke, (batch, 2, num_edges), 0, num_nodes, jnp.int32)

    # shared parameters
    w1, b1, w2, b2 = init_params(kp, input_dim, hidden_dim)

    # dense normalized adjacencies (glue, outside the kernel)
    a_hat = jax.vmap(
        lambda ei: gcn_normalized_adjacency(ei, num_nodes))(edge_index)

    # Pallas forward
    out = denoising_model_forward(a_hat, x, w1, b1, w2, b2)
    out = jax.block_until_ready(out)

    # reference 1: same bf16-input / f32-accumulation math, no Pallas
    def ref_forward_bf16(a, xb):
        a16 = a.astype(jnp.bfloat16)
        ax = jnp.dot(a16, xb.astype(jnp.bfloat16),
                     preferred_element_type=jnp.float32)
        h = jnp.dot(ax.astype(jnp.bfloat16), w1.astype(jnp.bfloat16),
                    preferred_element_type=jnp.float32) + b1
        h = jnp.maximum(h, 0.0).astype(jnp.bfloat16)
        hw2 = jnp.dot(h, w2.astype(jnp.bfloat16),
                      preferred_element_type=jnp.float32)
        return jnp.dot(a16, hw2.astype(jnp.bfloat16),
                       preferred_element_type=jnp.float32) + b2

    # reference 2: full f32 semantics of the original module
    def ref_forward_f32(a, xb):
        h = jnp.maximum(a @ (xb @ w1) + b1, 0.0)
        return a @ (h @ w2) + b2

    out_ref_bf = jax.vmap(ref_forward_bf16)(a_hat, x)
    out_ref_f32 = jax.vmap(ref_forward_f32)(a_hat, x)

    assert out.shape == (batch, num_nodes, input_dim)
    assert jnp.allclose(out, out_ref_bf, atol=1e-2, rtol=1e-2)
    assert jnp.allclose(out, out_ref_f32, atol=6e-2, rtol=6e-2)

    print("KERNEL_OK")
</pallas_src>

<mosaic_0001>
module attributes {stable_mosaic.version = 11 : i64} {
  func.func @gcn2_kernel(%arg0: i32, %arg1: memref<1x16x16xbf16, #tpu.memory_space<vmem>>, %arg2: memref<1x16x128xbf16, #tpu.memory_space<vmem>>, %arg3: memref<128x128xbf16, #tpu.memory_space<vmem>>, %arg4: memref<1x128xf32, #tpu.memory_space<vmem>>, %arg5: memref<128x128xbf16, #tpu.memory_space<vmem>>, %arg6: memref<1x128xf32, #tpu.memory_space<vmem>>, %arg7: memref<1x16x128xf32, #tpu.memory_space<vmem>>) attributes {dimension_semantics = [#tpu.dimension_semantics<parallel>], iteration_bounds = array<i64: 4>, scalar_prefetch = 0 : i64, scratch_operands = 0 : i64, tpu.core_type = #tpu.core_type<tc>, window_params = [{transform_indices = @transform_0, window_bounds = array<i64: 1, 16, 16>}, {transform_indices = @transform_1, window_bounds = array<i64: 1, 16, 128>}, {pipeline_mode = #tpu.pipeline_mode<synchronous>, transform_indices = @transform_2, window_bounds = array<i64: 128, 128>}, {pipeline_mode = #tpu.pipeline_mode<synchronous>, transform_indices = @transform_3, window_bounds = array<i64: 1, 128>}, {pipeline_mode = #tpu.pipeline_mode<synchronous>, transform_indices = @transform_4, window_bounds = array<i64: 128, 128>}, {pipeline_mode = #tpu.pipeline_mode<synchronous>, transform_indices = @transform_5, window_bounds = array<i64: 1, 128>}, {transform_indices = @transform_6, window_bounds = array<i64: 1, 16, 128>}]} {
    %c0 = arith.constant 0 : index
    %c0_0 = arith.constant 0 : index
    %c0_1 = arith.constant 0 : index
    %0 = vector.load %arg1[%c0, %c0_0, %c0_1] : memref<1x16x16xbf16, #tpu.memory_space<vmem>>, vector<1x16x16xbf16>
    %1 = vector.shape_cast %0 : vector<1x16x16xbf16> to vector<16x16xbf16>
    %c0_2 = arith.constant 0 : index
    %c0_3 = arith.constant 0 : index
    %c0_4 = arith.constant 0 : index
    %2 = vector.load %arg2[%c0_2, %c0_3, %c0_4] : memref<1x16x128xbf16, #tpu.memory_space<vmem>>, vector<1x16x128xbf16>
    %3 = vector.shape_cast %2 : vector<1x16x128xbf16> to vector<16x128xbf16>
    %cst = arith.constant dense<0.000000e+00> : vector<16x128xf32>
    %4 = tpu.matmul %1, %3, %cst {dimension_numbers = #tpu.dot_dimension_numbers<[1], [0], [0], [1], [0, 0, 1, 1], [], []>} : vector<16x16xbf16>, vector<16x128xbf16>, vector<16x128xf32> -> vector<16x128xf32>
    %5 = arith.truncf %4 : vector<16x128xf32> to vector<16x128xbf16>
    %c0_5 = arith.constant 0 : index
    %c0_6 = arith.constant 0 : index
    %6 = vector.load %arg3[%c0_5, %c0_6] : memref<128x128xbf16, #tpu.memory_space<vmem>>, vector<128x128xbf16>
    %cst_7 = arith.constant dense<0.000000e+00> : vector<16x128xf32>
    %7 = tpu.matmul %5, %6, %cst_7 {dimension_numbers = #tpu.dot_dimension_numbers<[1], [0], [0], [1], [0, 0, 1, 1], [], []>} : vector<16x128xbf16>, vector<128x128xbf16>, vector<16x128xf32> -> vector<16x128xf32>
    %c0_8 = arith.constant 0 : index
    %c0_9 = arith.constant 0 : index
    %8 = vector.load %arg4[%c0_8, %c0_9] : memref<1x128xf32, #tpu.memory_space<vmem>>, vector<1x128xf32>
    %9 = vector.broadcast %8 : vector<1x128xf32> to vector<16x128xf32>
    %10 = arith.addf %7, %9 : vector<16x128xf32>
    %cst_10 = arith.constant 0.000000e+00 : f32
    %11 = vector.broadcast %cst_10 : f32 to vector<16x128xf32>
    %12 = arith.maximumf %10, %11 : vector<16x128xf32>
    %13 = arith.truncf %12 : vector<16x128xf32> to vector<16x128xbf16>
    %c0_11 = arith.constant 0 : index
    %c0_12 = arith.constant 0 : index
    %14 = vector.load %arg5[%c0_11, %c0_12] : memref<128x128xbf16, #tpu.memory_space<vmem>>, vector<128x128xbf16>
    %cst_13 = arith.constant dense<0.000000e+00> : vector<16x128xf32>
    %15 = tpu.matmul %13, %14, %cst_13 {dimension_numbers = #tpu.dot_dimension_numbers<[1], [0], [0], [1], [0, 0, 1, 1], [], []>} : vector<16x128xbf16>, vector<128x128xbf16>, vector<16x128xf32> -> vector<16x128xf32>
    %16 = arith.truncf %15 : vector<16x128xf32> to vector<16x128xbf16>
    %cst_14 = arith.constant dense<0.000000e+00> : vector<16x128xf32>
    %17 = tpu.matmul %1, %16, %cst_14 {dimension_numbers = #tpu.dot_dimension_numbers<[1], [0], [0], [1], [0, 0, 1, 1], [], []>} : vector<16x16xbf16>, vector<16x128xbf16>, vector<16x128xf32> -> vector<16x128xf32>
    %c0_15 = arith.constant 0 : index
    %c0_16 = arith.constant 0 : index
    %18 = vector.load %arg6[%c0_15, %c0_16] : memref<1x128xf32, #tpu.memory_space<vmem>>, vector<1x128xf32>
    %19 = vector.broadcast %18 : vector<1x128xf32> to vector<16x128xf32>
    %20 = arith.addf %17, %19 : vector<16x128xf32>
    %c0_17 = arith.constant 0 : index
    %c0_18 = arith.constant 0 : index
    %c0_19 = arith.constant 0 : index
    %21 = vector.load %arg7[%c0_17, %c0_18, %c0_19] : memref<1x16x128xf32, #tpu.memory_space<vmem>>, vector<1x16x128xf32>
    %22 = vector.shape_cast %21 : vector<1x16x128xf32> to vector<16x128xf32>
    %23 = vector.shape_cast %20 : vector<16x128xf32> to vector<1x16x128xf32>
    tpu.vector_store %arg7[%c0_17, %c0_18, %c0_19], %23 {strides = array<i32>} : memref<1x16x128xf32, #tpu.memory_space<vmem>>, vector<1x16x128xf32>,
    return
  }
  func.func @transform_0(%arg0: i32) -> (i32, i32, i32) {
    %c0_i32 = arith.constant 0 : i32
    %c0_i32_0 = arith.constant 0 : i32
    %c0_i32_1 = arith.constant 0 : i32
    return %arg0, %c0_i32, %c0_i32_0 : i32, i32, i32
  }
  func.func @transform_1(%arg0: i32) -> (i32, i32, i32) {
    %c0_i32 = arith.constant 0 : i32
    %c0_i32_0 = arith.constant 0 : i32
    %c0_i32_1 = arith.constant 0 : i32
    return %arg0, %c0_i32, %c0_i32_0 : i32, i32, i32
  }
  func.func @transform_2(%arg0: i32) -> (i32, i32) {
    %c0_i32 = arith.constant 0 : i32
    %c0_i32_0 = arith.constant 0 : i32
    %c0_i32_1 = arith.constant 0 : i32
    return %c0_i32, %c0_i32_0 : i32, i32
  }
  func.func @transform_3(%arg0: i32) -> (i32, i32) {
    %c0_i32 = arith.constant 0 : i32
    %c0_i32_0 = arith.constant 0 : i32
    %c0_i32_1 = arith.constant 0 : i32
    return %c0_i32, %c0_i32_0 : i32, i32
  }
  func.func @transform_4(%arg0: i32) -> (i32, i32) {
    %c0_i32 = arith.constant 0 : i32
    %c0_i32_0 = arith.constant 0 : i32
    %c0_i32_1 = arith.constant 0 : i32
    return %c0_i32, %c0_i32_0 : i32, i32
  }
  func.func @transform_5(%arg0: i32) -> (i32, i32) {
    %c0_i32 = arith.constant 0 : i32
    %c0_i32_0 = arith.constant 0 : i32
    %c0_i32_1 = arith.constant 0 : i32
    return %c0_i32, %c0_i32_0 : i32, i32
  }
  func.func @transform_6(%arg0: i32) -> (i32, i32, i32) {
    %c0_i32 = arith.constant 0 : i32
    %c0_i32_0 = arith.constant 0 : i32
    %c0_i32_1 = arith.constant 0 : i32
    return %arg0, %c0_i32, %c0_i32_0 : i32, i32, i32
  }
}

</mosaic_0001>

<bundles_post_ra>
// kernel: denoising_model_forward.1
= control target key start
LH: loop header
LB: loop body
LE: loop exit
PB: predicated region body
PF: predicated region fallthrough
CT: control target
= control target key end

     0   :  { %s857_s21 = smov 0   ;;  %s967_s0 = inlined_call_operand.vmem [shape: bf16[4,16,16], index: 0, kind: input, shape index: {}]   ;;  %s968_s1 = inlined_call_operand.vmem [shape: bf16[4,16,128], index: 1, kind: input, shape index: {}]   ;;  %s969_s2 = inlined_call_operand.vmem [shape: bf16[128,128], index: 2, kind: input, shape index: {}]   ;;  %s970_s3 = inlined_call_operand.vmem [shape: f32[1,128], index: 3, kind: input, shape index: {}]   ;;  %s971_s4 = inlined_call_operand.vmem [shape: bf16[128,128], index: 4, kind: input, shape index: {}]   ;;  %s972_s5 = inlined_call_operand.vmem [shape: f32[1,128], index: 5, kind: input, shape index: {}]   ;;  %s973_s6 = inlined_call_operand.vmem [shape: f32[4,16,128], index: 6, kind: output, shape index: {}]  }
   0x1 LB: > { %s672_s22 = sadd.s32 4294967295, %s818_s21   ;;  %p676_p0 = scmp.ge.s32.totalorder %s818_s21, 1  ;;  %s818_s21 = sphi %s857_s21, %s16_s21  }
   0x2   : > { %p222_p1 = scmp.lt.s32.totalorder %s818_s21, 5 }
   0x4   : > { %p223_p2 = pnand %p676_p0, %p222_p1 }
   0x5   : > { %p257_p3 = scmp.lt.s32.totalorder (!%p223_p2), %s672_s22, 3 }
   0x6   : > { %226 = sbr.rel (%p223_p2) target bundleno = 822 (0x336), region = 44 }
   0xb   : > { %v820_v0 = vmov 0.0   ;;  %vm821_vm0 = vmmov 0   ;;  %v796_v1 = vld [vmem:[%s969_s2 + $0x38] sm:$0xff]   ;;  %s975_s22 = smov (!%p257_p3, %s672_s22), 3  ;;  %v797_v2 = vld [vmem:[%s969_s2 + $0x30] sm:$0xff]   ;;  %v798_v4 = vld [vmem:[%s969_s2 + $0x28] sm:$0xff]  }
   0xc   : > { %732 = vmatprep.subr.bf16.mxu0 %v820_v0  ;;  %734 = vmatprep.mubr.msk.bf16.mxu0 %vm821_vm0, %v820_v0  ;;  %s707_s27 = sshll.u32 %s975_s22, 3  ;;  %vm288_vm1 = vcmask 130048   ;;  %v799_v6 = vld [vmem:[%s969_s2 + $0x20] sm:$0xff]   ;;  %v800_v7 = vld [vmem:[%s969_s2 + $0x18] sm:$0xff]   ;;  %v801_v8 = vld [vmem:[%s969_s2 + $0x10] sm:$0xff]   ;;  %s709_s18 = sshll.u32 %s975_s22, 4 }
   0xd   : > { %738 = vmatprep.subr.bf16.mxu1 %v820_v0  ;;  %754 = vmatprep.mubr.msk.bf16.mxu1 %vm821_vm0, %v820_v0  ;;  %s261_s30 = scalar_lea.vmem %s967_s0, %s707_s27  ;;  %s266_s9 = scalar_lea.vmem %s968_s1, %s707_s27  ;;  %v802_v9 = vld [vmem:[%s969_s2 + $0x8] sm:$0xff]   ;;  %v803_v10 = vld [vmem:[%s969_s2] sm:$0xff]   ;;  %v804_v11 = vld [vmem:[%s971_s4 + $0x38] sm:$0xff]  }
   0xe   : > { %739 = vmatpush3.bf16.msra.mxu1 %v796_v1  ;;  %v794_v3 = vld [vmem:[%s266_s9] sm:$0xff]   ;;  %v805_v12 = vld [vmem:[%s971_s4 + $0x30] sm:$0xff]   ;;  %v806_v13 = vld [vmem:[%s971_s4 + $0x28] sm:$0xff]   ;;  %s271_s25 = scalar_lea.vmem %s973_s6, %s709_s18 }
   0xf   : > { %740 = vmatprep.subr.bf16.mxu1 %v820_v0  ;;  %v890_v5 = vld [vmem:[%s261_s30] sm:$0xff]   ;;  %733 = vmatpush3.bf16.msra.mxu0 %v794_v3  ;;  %v808_v15 = vld [vmem:[%s971_s4 + $0x18] sm:$0xff]   ;;  %v809_v21 = vld [vmem:[%s971_s4 + $0x10] sm:$0xff]  }
  0x10   : > { %758 = vmatprep.subr.bf16.mxu0 %v820_v0  ;;  %v807_v14 = vld [vmem:[%s971_s4 + $0x20] sm:$0xff]   ;;  %v810_v22 = vld [vmem:[%s971_s4 + $0x8] sm:$0xff]  }
  0x11   : > { %v811_v23 = vld [vmem:[%s971_s4] sm:$0xff]  }
  0x12   : > { %741 = vmatpush3.bf16.msra.mxu1 %v797_v2  ;;  %735 = vmatmul.mubr.msk.bf16.vlgmr.msra.gmra.mxu0 %vm288_vm1, %v890_v5  ;;  %v686_v24 = vld [vmem:[%s970_s3] ss:$0 sm:$0xff] }
  0x13   : > { %742 = vmatprep.subr.bf16.mxu1 %v820_v0  ;;  %774 = vmatprep.mubr.msk.bf16.mxu0 %vm821_vm0, %v820_v0  ;;  %v703_v39 = vld [vmem:[%s972_s5] ss:$0 sm:$0xff] }
  0x14   : > { %759 = vmatpush3.bf16.msra.mxu0 %v804_v11 }
  0x15   : > { %760 = vmatprep.subr.bf16.mxu0 %v820_v0 }
  0x16   : > { %743 = vmatpush3.bf16.msra.mxu1 %v798_v4 }
  0x17   : > { %744 = vmatprep.subr.bf16.mxu1 %v820_v0 }
  0x18   : > { %761 = vmatpush3.bf16.msra.mxu0 %v805_v12 }
  0x19   : > { %762 = vmatprep.subr.bf16.mxu0 %v820_v0 }
  0x1a   : > { %745 = vmatpush3.bf16.msra.mxu1 %v799_v6 }
  0x1b   : > { %746 = vmatprep.subr.bf16.mxu1 %v820_v0 }
  0x1c   : > { %763 = vmatpush3.bf16.msra.mxu0 %v806_v13 }
  0x1d   : > { %764 = vmatprep.subr.bf16.mxu0 %v820_v0 }
  0x1e   : > { %747 = vmatpush3.bf16.msra.mxu1 %v800_v7 }
  0x1f   : > { %748 = vmatprep.subr.bf16.mxu1 %v820_v0 }
  0x20   : > { %765 = vmatpush3.bf16.msra.mxu0 %v807_v14 }
  0x21   : > { %766 = vmatprep.subr.bf16.mxu0 %v820_v0 }
  0x22   : > { %749 = vmatpush3.bf16.msra.mxu1 %v801_v8 }
  0x23   : > { %750 = vmatprep.subr.bf16.mxu1 %v820_v0 }
  0x24   : > { %767 = vmatpush3.bf16.msra.mxu0 %v808_v15 }
  0x25   : > { %768 = vmatprep.subr.bf16.mxu0 %v820_v0 }
  0x26   : > { %751 = vmatpush3.bf16.msra.mxu1 %v802_v9 }
  0x27   : > { %752 = vmatprep.subr.bf16.mxu1 %v820_v0 }
  0x28   : > { %769 = vmatpush3.bf16.msra.mxu0 %v809_v21 }
  0x29   : > { %770 = vmatprep.subr.bf16.mxu0 %v820_v0 }
  0x2a   : > { %753 = vmatpush3.bf16.msra.mxu1 %v803_v10 }
  0x2b   : > { %778 = vmatprep.subr.bf16.mxu1 %v820_v0 }
  0x2c   : > { %771 = vmatpush3.bf16.msra.mxu0 %v810_v22 }
  0x2d   : > { %772 = vmatprep.subr.bf16.mxu0 %v820_v0 }
  0x30   : > { %773 = vmatpush3.bf16.msra.mxu0 %v811_v23 }
  0xd2   : > { %v326_v16 = vpop.f32.mrf.mxu0 }
  0xd4   : > { %v736_v17 = vpop.f32.mrf.mxu0 }
  0xd6   : > { %v329_v18 = vpop.f32.mrf.mxu0 }
  0xd7   : > { %v333_v19 = vpack.c.bf16 %v329_v18, %v326_v16 }
  0xd8   : > { %v737_v20 = vpop.f32.mrf.mxu0 }
  0xd9   : > { %755 = vmatmul.mubr.bf16.vlgmr.msra.gmra.mxu1 %v333_v19 }
  0xda   : > { %780 = vmatprep.mubr.msk.bf16.mxu1 %vm821_vm0, %v820_v0 }
 0x199   : > { %v439_v25 = vpop.f32.mrf.mxu1 }
 0x19a   : > { %v440_v27 = vadd.f32 %v686_v24, %v439_v25 }
 0x19b   : > { %v756_v26 = vpop.f32.mrf.mxu1 }
 0x19c   : > { %v446_v31 = vmax.f32 %v440_v27, 0.0 }
 0x19d   : > { %v442_v28 = vpop.f32.mrf.mxu1 }
 0x19e   : > { %v443_v29 = vadd.f32 %v686_v24, %v442_v28 }
 0x19f   : > { %v757_v30 = vpop.f32.mrf.mxu1 }
 0x1a0   : > { %v447_v32 = vmax.f32 %v443_v29, 0.0 }
 0x1a2   : > { %v448_v33 = vpack.c.bf16 %v447_v32, %v446_v31 }
 0x1a4   : > { %775 = vmatmul.mubr.bf16.vlgmr.msra.gmra.mxu0 %v448_v33 }
 0x264   : > { %v547_v34 = vpop.f32.mrf.mxu0 }
 0x266   : > { %v776_v35 = vpop.f32.mrf.mxu0 }
 0x268   : > { %v550_v36 = vpop.f32.mrf.mxu0 }
 0x269   : > { %v554_v37 = vpack.c.bf16 %v550_v36, %v547_v34 }
 0x26a   : > { %v777_v38 = vpop.f32.mrf.mxu0 }
 0x26b   : > { %779 = vmatpush3.bf16.msra.mxu1 %v554_v37 }
 0x26e   : > { %781 = vmatmul.mubr.msk.bf16.vlgmr.msra.gmra.mxu1 %vm288_vm1, %v890_v5 }
 0x32e   : > { %v596_v40 = vpop.f32.mrf.mxu1 }
 0x32f   : > { %v597_v41 = vadd.f32 %v703_v39, %v596_v40 }
 0x330   : > { %v782_v42 = vpop.f32.mrf.mxu1 }
 0x331   : > { %603 = vst [vmem:[%s271_s25] sm:$0xff] %v597_v41 }
 0x332   : > { %v599_v43 = vpop.f32.mrf.mxu1 }
 0x333   : > { %v600_v44 = vadd.f32 %v703_v39, %v599_v43 }
 0x334   : > { %v783_v45 = vpop.f32.mrf.mxu1 }
 0x335   : > { %604 = vst [vmem:[%s271_s25 + $0x8] sm:$0xff] %v600_v44 }
 0x336 PF: > { %s16_s21 = sadd.s32 1, %s818_s21  }
 0x337   : > { %p13_p4 = scmp.ge.s32.totalorder %s16_s21, 6  }
 0x339   :  { %15 = sbr.rel (!%p13_p4) target bundleno = 1 (0x1), region = 77 }

</bundles_post_ra>
